<compile_context>
chip_gen: v7x
topology: tpu7x:2x2x1
jax: 0.10.0
libtpu: 0.0.40
codegen_flags: <defaults>
</compile_context>

<pallas_src>
import jax
import jax.numpy as jnp
from jax.experimental import pallas as pl
from jax.experimental.pallas import tpu as pltpu

# Tile caps (multiples of (8, 128)); 256*2048*4B = 2 MiB per f32 buffer.
_TM_MAX = 256
_TN_MAX = 2048

# Below this many bytes, plain jnp is faster than launching a kernel.
_SMALL_INPUT_BYTES = 2 << 20


def _round_up(v, m):
    return ((v + m - 1) // m) * m


def _normalization_kernel(x_ref, mean_ref, inv_ref, o_ref):
    # x_ref: (TM, TN); mean_ref / inv_ref: (TM, 1) -> broadcast over lanes.
    # Subtract + multiply-by-reciprocal keeps the VPU off the divide sequence;
    # the kernel rides the HBM / vector-store roofline.
    o_ref[...] = (x_ref[...] - mean_ref[...]) * inv_ref[...]


def normalization_forward(x, mean, sigma, *, force_pallas=False):
    """Equivalent of Normalization.forward for (N, C, *spatial) inputs (ndim >= 2)."""
    assert x.ndim >= 2, "Normalization expects at least (N, C) input"
    orig_shape = x.shape
    n, c = int(orig_shape[0]), int(orig_shape[1])
    s = 1
    for d in orig_shape[2:]:
        s *= int(d)

    # Parameters broadcast like mean.view([1, -1, 1, ..., 1]) in PyTorch.
    # NOTE: params are cast to x.dtype; for bf16 inputs with f32 params this
    # differs slightly from PyTorch's type promotion (which would compute in f32).
    mean_c = jnp.broadcast_to(jnp.asarray(mean, x.dtype).reshape(-1), (c,))
    sigma_c = jnp.broadcast_to(jnp.asarray(sigma, x.dtype).reshape(-1), (c,))
    inv_c = jnp.ones((), x.dtype) / sigma_c  # 1/0 -> inf, matching x/0 semantics

    # Small-input fallback: fused XLA elementwise is strictly faster here.
    if (not force_pallas) and x.size * x.dtype.itemsize < _SMALL_INPUT_BYTES:
        bshape = (1, c) + (1,) * (x.ndim - 2)
        return (x - mean_c.reshape(bshape)) * inv_c.reshape(bshape)

    r = n * c
    r_pad = _round_up(r, 8)
    s_pad = _round_up(s, 128)
    tm = min(_TM_MAX, r_pad)          # multiple of 8 (r_pad is)
    tn = min(_TN_MAX, s_pad)          # multiple of 128 (s_pad is)

    # Flatten to (rows, cols) and pad up to (8, 128) alignment.
    x2 = x.reshape(r, s)
    if r_pad != r or s_pad != s:
        x2 = jnp.pad(x2, ((0, r_pad - r), (0, s_pad - s)))

    # Per-row parameter columns (row index -> channel index = row % C).
    mean_rows = jnp.broadcast_to(mean_c[None, :], (n, c)).reshape(r, 1)
    inv_rows = jnp.broadcast_to(inv_c[None, :], (n, c)).reshape(r, 1)
    if r_pad != r:
        mean_rows = jnp.pad(mean_rows, ((0, r_pad - r), (0, 0)))
        inv_rows = jnp.pad(inv_rows, ((0, r_pad - r), (0, 0)), constant_values=1.0)

    grid = (pl.cdiv(r_pad, tm), pl.cdiv(s_pad, tn))

    out = pl.pallas_call(
        _normalization_kernel,
        out_shape=jax.ShapeDtypeStruct((r_pad, s_pad), x.dtype),
        grid=grid,
        in_specs=[
            pl.BlockSpec((tm, tn), lambda i, j: (i, j)),   # x tile
            pl.BlockSpec((tm, 1), lambda i, j: (i, 0)),    # per-row mean
            pl.BlockSpec((tm, 1), lambda i, j: (i, 0)),    # per-row 1/sigma
        ],
        out_specs=pl.BlockSpec((tm, tn), lambda i, j: (i, j)),
        compiler_params=pltpu.CompilerParams(
            dimension_semantics=("parallel", "parallel")),
    )(x2, mean_rows, inv_rows)

    return out[:r, :s].reshape(orig_shape)


if __name__ == "__main__":
    key = jax.random.PRNGKey(0)
    k1, k2 = jax.random.split(key)

    # --- Test 1: small NCHW input, spatial size a multiple of 128 ---
    N, C, H, W = 2, 4, 16, 16
    x = jax.random.normal(k1, (N, C, H, W), dtype=jnp.float32)
    mean = jnp.array([0.1, 0.2, 0.3, 0.4], dtype=jnp.float32)
    sigma = jnp.array([0.5, 1.0, 1.5, 2.0], dtype=jnp.float32)

    out = jax.block_until_ready(normalization_forward(x, mean, sigma, force_pallas=True))
    ref = (x - mean.reshape(1, -1, 1, 1)) / sigma.reshape(1, -1, 1, 1)
    assert out.shape == x.shape and out.dtype == x.dtype
    assert jnp.allclose(out, ref, atol=1e-5, rtol=1e-5), "mismatch vs reference (test 1)"

    # --- Test 2: odd spatial size (7x7 = 49) exercising the lane-padding path ---
    x2 = jax.random.normal(k2, (2, 3, 7, 7), dtype=jnp.float32)
    mean2 = jnp.array([0.485, 0.456, 0.406], dtype=jnp.float32)
    sigma2 = jnp.array([0.229, 0.224, 0.225], dtype=jnp.float32)
    out2 = jax.block_until_ready(
        normalization_forward(x2, mean2, sigma2, force_pallas=True))
    ref2 = (x2 - mean2.reshape(1, -1, 1, 1)) / sigma2.reshape(1, -1, 1, 1)
    assert out2.shape == x2.shape
    assert jnp.allclose(out2, ref2, atol=1e-5, rtol=1e-5), "mismatch vs reference (test 2)"

    # --- Test 3: small-input fallback path (plain jnp) ---
    out3 = jax.block_until_ready(normalization_forward(x, mean, sigma))
    assert jnp.allclose(out3, ref, atol=1e-5, rtol=1e-5), "mismatch vs reference (test 3)"

    print("KERNEL_OK")
</pallas_src>

<mosaic_0001>
module attributes {stable_mosaic.version = 11 : i64} {
  func.func @_normalization_kernel(%arg0: i32, %arg1: i32, %arg2: memref<8x256xf32, #tpu.memory_space<vmem>>, %arg3: memref<8x1xf32, #tpu.memory_space<vmem>>, %arg4: memref<8x1xf32, #tpu.memory_space<vmem>>, %arg5: memref<8x256xf32, #tpu.memory_space<vmem>>) attributes {dimension_semantics = [#tpu.dimension_semantics<parallel>, #tpu.dimension_semantics<parallel>], iteration_bounds = array<i64: 1, 1>, scalar_prefetch = 0 : i64, scratch_operands = 0 : i64, tpu.core_type = #tpu.core_type<tc>, window_params = [{transform_indices = @transform_0, window_bounds = array<i64: 8, 256>}, {transform_indices = @transform_1, window_bounds = array<i64: 8, 1>}, {transform_indices = @transform_2, window_bounds = array<i64: 8, 1>}, {transform_indices = @transform_3, window_bounds = array<i64: 8, 256>}]} {
    %c0 = arith.constant 0 : index
    %c0_0 = arith.constant 0 : index
    %0 = vector.load %arg2[%c0, %c0_0] : memref<8x256xf32, #tpu.memory_space<vmem>>, vector<8x256xf32>
    %c0_1 = arith.constant 0 : index
    %c0_2 = arith.constant 0 : index
    %1 = vector.load %arg3[%c0_1, %c0_2] : memref<8x1xf32, #tpu.memory_space<vmem>>, vector<8x1xf32>
    %2 = vector.broadcast %1 : vector<8x1xf32> to vector<8x256xf32>
    %3 = arith.subf %0, %2 : vector<8x256xf32>
    %c0_3 = arith.constant 0 : index
    %c0_4 = arith.constant 0 : index
    %4 = vector.load %arg4[%c0_3, %c0_4] : memref<8x1xf32, #tpu.memory_space<vmem>>, vector<8x1xf32>
    %5 = vector.broadcast %4 : vector<8x1xf32> to vector<8x256xf32>
    %6 = arith.mulf %3, %5 : vector<8x256xf32>
    %c0_5 = arith.constant 0 : index
    %c0_6 = arith.constant 0 : index
    %7 = vector.load %arg5[%c0_5, %c0_6] : memref<8x256xf32, #tpu.memory_space<vmem>>, vector<8x256xf32>
    tpu.vector_store %arg5[%c0_5, %c0_6], %6 {strides = array<i32>} : memref<8x256xf32, #tpu.memory_space<vmem>>, vector<8x256xf32>,
    return
  }
  func.func @transform_0(%arg0: i32, %arg1: i32) -> (i32, i32) {
    %c0_i32 = arith.constant 0 : i32
    return %arg0, %arg1 : i32, i32
  }
  func.func @transform_1(%arg0: i32, %arg1: i32) -> (i32, i32) {
    %c0_i32 = arith.constant 0 : i32
    %c0_i32_0 = arith.constant 0 : i32
    return %arg0, %c0_i32 : i32, i32
  }
  func.func @transform_2(%arg0: i32, %arg1: i32) -> (i32, i32) {
    %c0_i32 = arith.constant 0 : i32
    %c0_i32_0 = arith.constant 0 : i32
    return %arg0, %c0_i32 : i32, i32
  }
  func.func @transform_3(%arg0: i32, %arg1: i32) -> (i32, i32) {
    %c0_i32 = arith.constant 0 : i32
    return %arg0, %arg1 : i32, i32
  }
}

</mosaic_0001>

<bundles_post_ra>
// kernel: tpu_custom_call.1
= control target key start
LH: loop header
LB: loop body
LE: loop exit
PB: predicated region body
PF: predicated region fallthrough
CT: control target
= control target key end

     0   :  { %s122_s0 = inlined_call_operand.vmem [shape: f32[8,256], index: 0, kind: input, shape index: {}]   ;;  %s123_s1 = inlined_call_operand.vmem [shape: f32[8,1], index: 1, kind: input, shape index: {}]   ;;  %s124_s2 = inlined_call_operand.vmem [shape: f32[8,1], index: 2, kind: input, shape index: {}]   ;;  %s125_s3 = inlined_call_operand.hbm [shape: f32[8,256], index: 3, kind: output, shape index: {}]  }
   0x1   :  { %v17_v0 = vld [vmem:[%s123_s1] sm:$0xff] }
   0x2   :  { %8 = vsyncpa [#allocation3], 0  ;;  %v76_v1 = vmov 0   ;;  %v25_v2 = vld [vmem:[%s124_s2] sm:$0xff]  ;;  %v16_v5 = vld [vmem:[%s122_s0 + $0x8] sm:$0xff]  ;;  %s77_s20 = smov [#allocation2]  }
   0x3   :  { %51 = vset.pattern.permute.xlu0 %v76_v1  ;;  %v15_v4 = vld [vmem:[%s122_s0] sm:$0xff]  ;;  %s41_s1 = sshll.u32 %s77_s20, 4  ;;  %s42_s1 = int_to_ptr.vmem [resolvable:$true] %s41_s1 }
   0x4   :  { %20 = vperm.xlu0 %51, %v17_v0   ;;  %s52_s2 = scalar_lea.vmem %s42_s1, 256  ;;  %p57_p1 = scmp.lt.s32.totalorder %s42_s1, %s42_s1 }
   0x5   :  { %p53_p0 = scmp.ne.s32.totalorder %s42_s1, %s52_s2  ;;  %p58_p2 = scmp.lt.s32.totalorder %s52_s2, %s52_s2 }
   0x7   :  { %p59_p3 = por %p58_p2, %p57_p1 }
   0x8   :  { %28 = vperm.xlu0 %51, %v25_v2  }
   0x9   :  { %p60_p4 = pnand %p59_p3, %p53_p0 }
  0x83   :  { %v21_v3 = vpop.permute.xlu0 %20 }
  0x84   :  { %v23_v6 = vsub.f32 %v15_v4, %v21_v3  ;;  %v24_v7 = vsub.f32 %v16_v5, %v21_v3 }
  0x87   :  { %v29_v8 = vpop.permute.xlu0 %28 }
  0x88   :  { %v31_v9 = vmul.f32 %v29_v8, %v23_v6  ;;  %v32_v10 = vmul.f32 %v29_v8, %v24_v7 }
  0x8a   :  { %33 = vst [vmem:[#allocation2] sm:$0xff] %v31_v9  ;;  %34 = vst [vmem:[#allocation2 + $0x8] sm:$0xff] %v32_v10 }
  0x8b   :  { %63 = shalt.err (!%p60_p4)
}
  0x8c   :  { %s64_s0 = scalar_lea.hbm %s125_s3, 256 }
  0x8d   :  { %p65_p5 = scmp.ne.s32.totalorder %s125_s3, %s64_s0  ;;  %p68_p6 = scmp.lt.u32.totalorder %s64_s0, %s125_s3 }
  0x8f   :  { %p70_p7 = pnand %p68_p6, %p65_p5 }
  0x91   :  { %73 = shalt.err (!%p70_p7)
}
  0x92   :  { %44 = dma.vmem_to_hbm [thread:$0]  %s42_s1, 256, %s125_s3, [#allocation3]  }
  0x93   :  { %74 = dma.done.wait [#allocation3], 256  }
  0x94   :  { %75 = vsyncadd [#allocation3], 4294967040 }
  0x95   :  { %48 = vsyncpa [#allocation3], 1 }

</bundles_post_ra>
